<compile_context>
chip_gen: v7x
topology: tpu7x:2x2x1
jax: 0.10.0
libtpu: 0.0.40
codegen_flags: <defaults>
</compile_context>

<pallas_src>
import jax
import jax.numpy as jnp
from jax.experimental import pallas as pl
from jax.experimental.pallas import tpu as pltpu


def sts_kernel(pool_ref, in_ref, wenc_ref, benc_ref,
               w1a_ref, w1b_ref, w1c_ref, w1d_ref, b1_ref,
               w2_ref, b2_ref, out_ref):
    tb = out_ref.shape[0]  # pairs per grid block (multiple of 8 -> aligned sublane split)

    # ---- encoder: mean-pool via MXU (block-diag 1/SEQ matrix), then Linear(E->H) ----
    # pool: (2*TB, 2*TB*SEQ), in: (2*TB*SEQ, E)  ->  pooled: (2*TB, E)
    pooled = jnp.dot(pool_ref[...], in_ref[...],
                     preferred_element_type=jnp.float32)
    # Both sentences of every pair in ONE MXU pass: (2*TB, E) @ (E, H)
    x_all = jnp.dot(pooled, wenc_ref[...],
                    preferred_element_type=jnp.float32) + benc_ref[...]

    x1 = x_all[:tb, :]            # (TB, H)  sentence-1 encodings
    x2 = x_all[tb:, :]            # (TB, H)  sentence-2 encodings

    # ---- STS features (kept on sublane axis; no lane-dim concat) ----
    diff = jnp.abs(x1 - x2)
    mult = x1 * x2

    # ---- MLP layer 1: pre-split w1 slabs replace cat + single big dot ----
    h = (jnp.dot(x1,   w1a_ref[...], preferred_element_type=jnp.float32)
         + jnp.dot(x2,   w1b_ref[...], preferred_element_type=jnp.float32)
         + jnp.dot(diff, w1c_ref[...], preferred_element_type=jnp.float32)
         + jnp.dot(mult, w1d_ref[...], preferred_element_type=jnp.float32)
         + b1_ref[...])
    h = jnp.maximum(h, 0.0)                                   # F.relu

    # ---- MLP layer 2 (pre-ReLU output), lane-dense padded to 128 ----
    out_ref[...] = jnp.dot(h, w2_ref[...],
                           preferred_element_type=jnp.float32) + b2_ref[...]


def sts_predictor(input1, input2, params, *, tb=8):
    """input1/input2: (B, SEQ, E) token embeddings; encoder = mean-pool + Linear."""
    w_enc, b_enc, w1, b1, w2, b2 = params
    B, SEQ, E = input1.shape
    H = w_enc.shape[1]
    L1 = w1.shape[1]
    L2 = w2.shape[1]
    assert B % tb == 0, "batch must be a multiple of the per-block pair count"
    nblocks = B // tb
    rows = 2 * tb * SEQ

    # Lane-dense head: pad L2 -> multiple of 128 with zero columns.
    L2p = ((L2 + 127) // 128) * 128
    w2p = jnp.pad(w2, ((0, 0), (0, L2p - L2)))
    b2p = jnp.pad(b2, ((0, 0), (0, L2p - L2)))

    # Pre-split w1 into the four feature slabs (order: x1, x2, |x1-x2|, x1*x2).
    w1a, w1b, w1c, w1d = w1[0:H], w1[H:2 * H], w1[2 * H:3 * H], w1[3 * H:4 * H]

    # Per-block contiguous layout: [TB pairs of sentence-1 ; TB pairs of sentence-2].
    in_blocks = jnp.concatenate(
        [input1.reshape(nblocks, tb * SEQ, E),
         input2.reshape(nblocks, tb * SEQ, E)], axis=1)        # (nblocks, 2*TB*SEQ, E)
    inputs_flat = in_blocks.reshape(nblocks * rows, E)

    # Block-diagonal mean-pooling matrix (same for every grid block).
    pool = jnp.kron(jnp.eye(2 * tb, dtype=jnp.float32),
                    jnp.full((1, SEQ), 1.0 / SEQ, jnp.float32))  # (2*TB, 2*TB*SEQ)

    def full(arr):  # grid-invariant, whole-array block (stays resident in VMEM)
        return pl.BlockSpec(arr.shape, lambda i: (0,) * arr.ndim)

    in_specs = [
        full(pool),
        pl.BlockSpec((rows, E), lambda i: (i, 0)),             # per-block token slab
        full(w_enc), full(b_enc),
        full(w1a), full(w1b), full(w1c), full(w1d), full(b1),
        full(w2p), full(b2p),
    ]
    out_spec = pl.BlockSpec((tb, L2p), lambda i: (i, 0))

    operands = (pool, inputs_flat, w_enc, b_enc, w1a, w1b, w1c, w1d, b1, w2p, b2p)
    flops = 2 * nblocks * (
        (2 * tb) * rows * E           # pooling matmul
        + (2 * tb) * E * H            # encoder linear
        + 4 * tb * H * L1             # MLP layer 1 (four slabs)
        + tb * L1 * L2p)              # MLP layer 2 (padded)
    bytes_accessed = sum(int(a.size) * a.dtype.itemsize for a in operands) + B * L2p * 4

    out_padded = pl.pallas_call(
        sts_kernel,
        out_shape=jax.ShapeDtypeStruct((B, L2p), jnp.float32),
        grid_spec=pltpu.PrefetchScalarGridSpec(
            num_scalar_prefetch=0,
            grid=(nblocks,),
            in_specs=in_specs,
            out_specs=out_spec),
        compiler_params=pltpu.CompilerParams(
            dimension_semantics=("parallel",)),
        cost_estimate=pl.CostEstimate(
            flops=flops, transcendentals=0, bytes_accessed=bytes_accessed),
    )(*operands)
    return out_padded[:, :L2]


def reference(input1, input2, params):
    """Pure-JAX reference of the same (batched) forward pass."""
    w_enc, b_enc, w1, b1, w2, b2 = params
    x1 = jnp.mean(input1, axis=1) @ w_enc + b_enc
    x2 = jnp.mean(input2, axis=1) @ w_enc + b_enc
    x = jnp.concatenate([x1, x2, jnp.abs(x1 - x2), x1 * x2], axis=-1)
    h = jnp.maximum(x @ w1 + b1, 0.0)
    return h @ w2 + b2


if __name__ == "__main__":
    # Small shapes: batch=16 pairs, seq=8, emb=32, hidden=32 -> layers = [4*32, 64, 8]
    B, SEQ, EMB, HID = 16, 8, 32, 32
    L1, L2 = 64, 8

    key = jax.random.PRNGKey(0)
    k_in1, k_in2, k_we, k_be, k_w1, k_b1, k_w2, k_b2 = jax.random.split(key, 8)

    input1 = jax.random.normal(k_in1, (B, SEQ, EMB), jnp.float32)
    input2 = jax.random.normal(k_in2, (B, SEQ, EMB), jnp.float32)

    # nn.Linear-style parameters, stored transposed as (in, out).
    w_enc = 0.1 * jax.random.normal(k_we, (EMB, HID), jnp.float32)
    b_enc = 0.1 * jax.random.normal(k_be, (1, HID), jnp.float32)
    w1 = 0.1 * jax.random.normal(k_w1, (4 * HID, L1), jnp.float32)
    b1 = 0.1 * jax.random.normal(k_b1, (1, L1), jnp.float32)
    w2 = 0.1 * jax.random.normal(k_w2, (L1, L2), jnp.float32)
    b2 = 0.1 * jax.random.normal(k_b2, (1, L2), jnp.float32)
    params = (w_enc, b_enc, w1, b1, w2, b2)

    out = jax.block_until_ready(sts_predictor(input1, input2, params))
    ref = reference(input1, input2, params)
    assert out.shape == (B, L2)
    assert jnp.allclose(out, ref, atol=1e-3, rtol=1e-3), (out, ref)

    # TODO(synk): dropout-enabled LinearBlock path (drops=...) is training-only and omitted.
    print("KERNEL_OK")
</pallas_src>

<mosaic_0001>
module attributes {stable_mosaic.version = 11 : i64} {
  func.func @sts_kernel(%arg0: i32, %arg1: memref<16x128xf32, #tpu.memory_space<vmem>>, %arg2: memref<128x32xf32, #tpu.memory_space<vmem>>, %arg3: memref<32x32xf32, #tpu.memory_space<vmem>>, %arg4: memref<1x32xf32, #tpu.memory_space<vmem>>, %arg5: memref<32x64xf32, #tpu.memory_space<vmem>>, %arg6: memref<32x64xf32, #tpu.memory_space<vmem>>, %arg7: memref<32x64xf32, #tpu.memory_space<vmem>>, %arg8: memref<32x64xf32, #tpu.memory_space<vmem>>, %arg9: memref<1x64xf32, #tpu.memory_space<vmem>>, %arg10: memref<64x128xf32, #tpu.memory_space<vmem>>, %arg11: memref<1x128xf32, #tpu.memory_space<vmem>>, %arg12: memref<8x128xf32, #tpu.memory_space<vmem>>) attributes {dimension_semantics = [#tpu.dimension_semantics<parallel>], iteration_bounds = array<i64: 2>, scalar_prefetch = 0 : i64, scratch_operands = 0 : i64, tpu.core_type = #tpu.core_type<tc>, window_params = [{pipeline_mode = #tpu.pipeline_mode<synchronous>, transform_indices = @transform_0, window_bounds = array<i64: 16, 128>}, {transform_indices = @transform_1, window_bounds = array<i64: 128, 32>}, {pipeline_mode = #tpu.pipeline_mode<synchronous>, transform_indices = @transform_2, window_bounds = array<i64: 32, 32>}, {pipeline_mode = #tpu.pipeline_mode<synchronous>, transform_indices = @transform_3, window_bounds = array<i64: 1, 32>}, {pipeline_mode = #tpu.pipeline_mode<synchronous>, transform_indices = @transform_4, window_bounds = array<i64: 32, 64>}, {pipeline_mode = #tpu.pipeline_mode<synchronous>, transform_indices = @transform_5, window_bounds = array<i64: 32, 64>}, {pipeline_mode = #tpu.pipeline_mode<synchronous>, transform_indices = @transform_6, window_bounds = array<i64: 32, 64>}, {pipeline_mode = #tpu.pipeline_mode<synchronous>, transform_indices = @transform_7, window_bounds = array<i64: 32, 64>}, {pipeline_mode = #tpu.pipeline_mode<synchronous>, transform_indices = @transform_8, window_bounds = array<i64: 1, 64>}, {pipeline_mode = #tpu.pipeline_mode<synchronous>, transform_indices = @transform_9, window_bounds = array<i64: 64, 128>}, {pipeline_mode = #tpu.pipeline_mode<synchronous>, transform_indices = @transform_10, window_bounds = array<i64: 1, 128>}, {transform_indices = @transform_11, window_bounds = array<i64: 8, 128>}]} {
    %c0 = arith.constant 0 : index
    %c0_0 = arith.constant 0 : index
    %0 = vector.load %arg1[%c0, %c0_0] : memref<16x128xf32, #tpu.memory_space<vmem>>, vector<16x128xf32>
    %c0_1 = arith.constant 0 : index
    %c0_2 = arith.constant 0 : index
    %1 = vector.load %arg2[%c0_1, %c0_2] : memref<128x32xf32, #tpu.memory_space<vmem>>, vector<128x32xf32>
    %cst = arith.constant dense<0.000000e+00> : vector<16x32xf32>
    %2 = tpu.matmul %0, %1, %cst {dimension_numbers = #tpu.dot_dimension_numbers<[1], [0], [0], [1], [0, 0, 1, 1], [], []>} : vector<16x128xf32>, vector<128x32xf32>, vector<16x32xf32> -> vector<16x32xf32>
    %c0_3 = arith.constant 0 : index
    %c0_4 = arith.constant 0 : index
    %3 = vector.load %arg3[%c0_3, %c0_4] : memref<32x32xf32, #tpu.memory_space<vmem>>, vector<32x32xf32>
    %cst_5 = arith.constant dense<0.000000e+00> : vector<16x32xf32>
    %4 = tpu.matmul %2, %3, %cst_5 {dimension_numbers = #tpu.dot_dimension_numbers<[1], [0], [0], [1], [0, 0, 1, 1], [], []>} : vector<16x32xf32>, vector<32x32xf32>, vector<16x32xf32> -> vector<16x32xf32>
    %c0_6 = arith.constant 0 : index
    %c0_7 = arith.constant 0 : index
    %5 = vector.load %arg4[%c0_6, %c0_7] : memref<1x32xf32, #tpu.memory_space<vmem>>, vector<1x32xf32>
    %6 = vector.broadcast %5 : vector<1x32xf32> to vector<16x32xf32>
    %7 = arith.addf %4, %6 : vector<16x32xf32>
    %8 = vector.extract_strided_slice %7 {offsets = [0, 0], sizes = [8, 32], strides = [1, 1]} : vector<16x32xf32> to vector<8x32xf32>
    %9 = vector.extract_strided_slice %7 {offsets = [8, 0], sizes = [8, 32], strides = [1, 1]} : vector<16x32xf32> to vector<8x32xf32>
    %10 = arith.subf %8, %9 : vector<8x32xf32>
    %11 = math.absf %10 : vector<8x32xf32>
    %12 = arith.mulf %8, %9 : vector<8x32xf32>
    %c0_8 = arith.constant 0 : index
    %c0_9 = arith.constant 0 : index
    %13 = vector.load %arg5[%c0_8, %c0_9] : memref<32x64xf32, #tpu.memory_space<vmem>>, vector<32x64xf32>
    %cst_10 = arith.constant dense<0.000000e+00> : vector<8x64xf32>
    %14 = tpu.matmul %8, %13, %cst_10 {dimension_numbers = #tpu.dot_dimension_numbers<[1], [0], [0], [1], [0, 0, 1, 1], [], []>} : vector<8x32xf32>, vector<32x64xf32>, vector<8x64xf32> -> vector<8x64xf32>
    %c0_11 = arith.constant 0 : index
    %c0_12 = arith.constant 0 : index
    %15 = vector.load %arg6[%c0_11, %c0_12] : memref<32x64xf32, #tpu.memory_space<vmem>>, vector<32x64xf32>
    %cst_13 = arith.constant dense<0.000000e+00> : vector<8x64xf32>
    %16 = tpu.matmul %9, %15, %cst_13 {dimension_numbers = #tpu.dot_dimension_numbers<[1], [0], [0], [1], [0, 0, 1, 1], [], []>} : vector<8x32xf32>, vector<32x64xf32>, vector<8x64xf32> -> vector<8x64xf32>
    %17 = arith.addf %14, %16 : vector<8x64xf32>
    %c0_14 = arith.constant 0 : index
    %c0_15 = arith.constant 0 : index
    %18 = vector.load %arg7[%c0_14, %c0_15] : memref<32x64xf32, #tpu.memory_space<vmem>>, vector<32x64xf32>
    %cst_16 = arith.constant dense<0.000000e+00> : vector<8x64xf32>
    %19 = tpu.matmul %11, %18, %cst_16 {dimension_numbers = #tpu.dot_dimension_numbers<[1], [0], [0], [1], [0, 0, 1, 1], [], []>} : vector<8x32xf32>, vector<32x64xf32>, vector<8x64xf32> -> vector<8x64xf32>
    %20 = arith.addf %17, %19 : vector<8x64xf32>
    %c0_17 = arith.constant 0 : index
    %c0_18 = arith.constant 0 : index
    %21 = vector.load %arg8[%c0_17, %c0_18] : memref<32x64xf32, #tpu.memory_space<vmem>>, vector<32x64xf32>
    %cst_19 = arith.constant dense<0.000000e+00> : vector<8x64xf32>
    %22 = tpu.matmul %12, %21, %cst_19 {dimension_numbers = #tpu.dot_dimension_numbers<[1], [0], [0], [1], [0, 0, 1, 1], [], []>} : vector<8x32xf32>, vector<32x64xf32>, vector<8x64xf32> -> vector<8x64xf32>
    %23 = arith.addf %20, %22 : vector<8x64xf32>
    %c0_20 = arith.constant 0 : index
    %c0_21 = arith.constant 0 : index
    %24 = vector.load %arg9[%c0_20, %c0_21] : memref<1x64xf32, #tpu.memory_space<vmem>>, vector<1x64xf32>
    %25 = vector.broadcast %24 : vector<1x64xf32> to vector<8x64xf32>
    %26 = arith.addf %23, %25 : vector<8x64xf32>
    %cst_22 = arith.constant 0.000000e+00 : f32
    %27 = vector.broadcast %cst_22 : f32 to vector<8x64xf32>
    %28 = arith.maximumf %26, %27 : vector<8x64xf32>
    %c0_23 = arith.constant 0 : index
    %c0_24 = arith.constant 0 : index
    %29 = vector.load %arg10[%c0_23, %c0_24] : memref<64x128xf32, #tpu.memory_space<vmem>>, vector<64x128xf32>
    %cst_25 = arith.constant dense<0.000000e+00> : vector<8x128xf32>
    %30 = tpu.matmul %28, %29, %cst_25 {dimension_numbers = #tpu.dot_dimension_numbers<[1], [0], [0], [1], [0, 0, 1, 1], [], []>} : vector<8x64xf32>, vector<64x128xf32>, vector<8x128xf32> -> vector<8x128xf32>
    %c0_26 = arith.constant 0 : index
    %c0_27 = arith.constant 0 : index
    %31 = vector.load %arg11[%c0_26, %c0_27] : memref<1x128xf32, #tpu.memory_space<vmem>>, vector<1x128xf32>
    %32 = vector.broadcast %31 : vector<1x128xf32> to vector<8x128xf32>
    %33 = arith.addf %30, %32 : vector<8x128xf32>
    %c0_28 = arith.constant 0 : index
    %c0_29 = arith.constant 0 : index
    %34 = vector.load %arg12[%c0_28, %c0_29] : memref<8x128xf32, #tpu.memory_space<vmem>>, vector<8x128xf32>
    tpu.vector_store %arg12[%c0_28, %c0_29], %33 {strides = array<i32>} : memref<8x128xf32, #tpu.memory_space<vmem>>, vector<8x128xf32>,
    return
  }
  func.func @transform_0(%arg0: i32) -> (i32, i32) {
    %c0_i32 = arith.constant 0 : i32
    %c0_i32_0 = arith.constant 0 : i32
    %c0_i32_1 = arith.constant 0 : i32
    return %c0_i32, %c0_i32_0 : i32, i32
  }
  func.func @transform_1(%arg0: i32) -> (i32, i32) {
    %c0_i32 = arith.constant 0 : i32
    %c0_i32_0 = arith.constant 0 : i32
    return %arg0, %c0_i32 : i32, i32
  }
  func.func @transform_2(%arg0: i32) -> (i32, i32) {
    %c0_i32 = arith.constant 0 : i32
    %c0_i32_0 = arith.constant 0 : i32
    %c0_i32_1 = arith.constant 0 : i32
    return %c0_i32, %c0_i32_0 : i32, i32
  }
  func.func @transform_3(%arg0: i32) -> (i32, i32) {
    %c0_i32 = arith.constant 0 : i32
    %c0_i32_0 = arith.constant 0 : i32
    %c0_i32_1 = arith.constant 0 : i32
    return %c0_i32, %c0_i32_0 : i32, i32
  }
  func.func @transform_4(%arg0: i32) -> (i32, i32) {
    %c0_i32 = arith.constant 0 : i32
    %c0_i32_0 = arith.constant 0 : i32
    %c0_i32_1 = arith.constant 0 : i32
    return %c0_i32, %c0_i32_0 : i32, i32
  }
  func.func @transform_5(%arg0: i32) -> (i32, i32) {
    %c0_i32 = arith.constant 0 : i32
    %c0_i32_0 = arith.constant 0 : i32
    %c0_i32_1 = arith.constant 0 : i32
    return %c0_i32, %c0_i32_0 : i32, i32
  }
  func.func @transform_6(%arg0: i32) -> (i32, i32) {
    %c0_i32 = arith.constant 0 : i32
    %c0_i32_0 = arith.constant 0 : i32
    %c0_i32_1 = arith.constant 0 : i32
    return %c0_i32, %c0_i32_0 : i32, i32
  }
  func.func @transform_7(%arg0: i32) -> (i32, i32) {
    %c0_i32 = arith.constant 0 : i32
    %c0_i32_0 = arith.constant 0 : i32
    %c0_i32_1 = arith.constant 0 : i32
    return %c0_i32, %c0_i32_0 : i32, i32
  }
  func.func @transform_8(%arg0: i32) -> (i32, i32) {
    %c0_i32 = arith.constant 0 : i32
    %c0_i32_0 = arith.constant 0 : i32
    %c0_i32_1 = arith.constant 0 : i32
    return %c0_i32, %c0_i32_0 : i32, i32
  }
  func.func @transform_9(%arg0: i32) -> (i32, i32) {
    %c0_i32 = arith.constant 0 : i32
    %c0_i32_0 = arith.constant 0 : i32
    %c0_i32_1 = arith.constant 0 : i32
    return %c0_i32, %c0_i32_0 : i32, i32
  }
  func.func @transform_10(%arg0: i32) -> (i32, i32) {
    %c0_i32 = arith.constant 0 : i32
    %c0_i32_0 = arith.constant 0 : i32
    %c0_i32_1 = arith.constant 0 : i32
    return %c0_i32, %c0_i32_0 : i32, i32
  }
  func.func @transform_11(%arg0: i32) -> (i32, i32) {
    %c0_i32 = arith.constant 0 : i32
    %c0_i32_0 = arith.constant 0 : i32
    return %arg0, %c0_i32 : i32, i32
  }
}

</mosaic_0001>

<bundles_post_ra>
// kernel: tpu_custom_call.1
= control target key start
LH: loop header
LB: loop body
LE: loop exit
PB: predicated region body
PF: predicated region fallthrough
CT: control target
= control target key end

     0   :  { %16 = vsyncpa [#allocation3], 0  ;;  %s1726_s0 = inlined_call_operand.vmem [shape: f32[16,128], index: 0, kind: input, shape index: {}]   ;;  %s1727_s1 = inlined_call_operand.vmem [shape: f32[256,32], index: 1, kind: input, shape index: {}]   ;;  %s1728_s2 = inlined_call_operand.vmem [shape: f32[32,32], index: 2, kind: input, shape index: {}]   ;;  %s1729_s3 = inlined_call_operand.vmem [shape: f32[1,32], index: 3, kind: input, shape index: {}]   ;;  %s1730_s4 = inlined_call_operand.vmem [shape: f32[32,64], index: 4, kind: input, shape index: {}]   ;;  %s1731_s5 = inlined_call_operand.vmem [shape: f32[32,64], index: 5, kind: input, shape index: {}]   ;;  %s1732_s6 = inlined_call_operand.vmem [shape: f32[32,64], index: 6, kind: input, shape index: {}]   ;;  %s1733_s7 = inlined_call_operand.vmem [shape: f32[32,64], index: 7, kind: input, shape index: {}]   ;;  %s1734_s8 = inlined_call_operand.vmem [shape: f32[1,64], index: 8, kind: input, shape index: {}]   ;;  %s1735_s9 = inlined_call_operand.vmem [shape: f32[64,128], index: 9, kind: input, shape index: {}]   ;;  %s1736_s10 = inlined_call_operand.vmem [shape: f32[1,128], index: 10, kind: input, shape index: {}]   ;;  %s1737_s11 = inlined_call_operand.hbm [shape: f32[16,128], index: 11, kind: output, shape index: {}]  }
   0x1   :  { %18 = vsyncpa [#allocation3 + $0x1], 0  ;;  %s1487_s17 = smov 0   ;;  %s1489_s18 = smov 0  }
   0x2   :  { %s1491_s19 = smov 0   ;;  %s1493_s20 = smov 0  }
   0x3 LB: > { %s1508_s21 = sadd.s32 4294967295, %s1421_s20   ;;  %s1058_s22 = sadd.s32 4294967294, %s1421_s20   ;;  %s1421_s20 = sphi %s1493_s20, %s1745_s20   ;;  %s1417_s19 = sphi %s1491_s19, %s1744_s19   ;;  %s1413_s18 = sphi %s1489_s18, %s1743_s18   ;;  %s1409_s17 = sphi %s1487_s17, %s1742_s17  }
   0x4   : > { %s1512_s23 = sadd.s32 1, %s1421_s20   ;;  %s267_s24 = sadd.s32 1, %s1417_s19 }
   0x5   : > { %s264_s25 = ssub.s32 %s1421_s20, %s1512_s23  ;;  %p277_p0 = scmp.ne.s32.totalorder %s1417_s19, %s1413_s18 }
   0x6   : > { %p265_p1 = scmp.eq.s32.totalorder %s264_s25, 0  ;;  %p278_p2 = scmp.eq.s32.totalorder %s1508_s21, 1 }
   0x7   : > { %p283_p3 = scmp.ne.s32.totalorder %s1413_s18, %s1409_s17  ;;  %p284_p4 = scmp.eq.s32.totalorder %s1058_s22, 1 }
   0x8   : > { %s1523_s26 = scalar_select %p265_p1, %s1417_s19, %s267_s24  }
   0x9   : > { %p1525_p5 = por %p278_p2, %p277_p0  ;;  %p1529_p6 = por %p284_p4, %p283_p3 }
   0xa   : > { %1738 = sst [smem:[#allocation5_spill]] %s1523_s26  ;;  %p1061_p7 = scmp.ge.s32.totalorder %s1421_s20, 1 }
   0xb   : > { %p341_p8 = scmp.lt.s32.totalorder %s1421_s20, 3 }
   0xd   : > { %p342_p9 = pnand %p1061_p7, %p341_p8 }
   0xe   : > { %s1063_s29 = sshll.u32 (!%p342_p9), %s1508_s21, 4  ;;  %v387_v0 = vld [vmem:[%s1726_s0] sm:$0xff] (!%p342_p9)  ;;  %v481_v2 = vld [vmem:[%s1728_s2 + $0x8] sm:$0xff] (!%p342_p9)  ;;  %v482_v3 = vld [vmem:[%s1728_s2 + $0x10] sm:$0xff] (!%p342_p9)  ;;  %v1423_v32 = vmov (!%p342_p9), 0.0|0.0   ;;  %vm491_vm0 = vcmask (!%p342_p9), 261120  }
   0xf   : > { %345 = sbr.rel (%p342_p9) target bundleno = 952 (0x3b8), region = 64  ;;  %v480_v1 = vld [vmem:[%s1728_s2] sm:$0xff] (!%p342_p9)  ;;  %p382_p10 = scmp.lt.s32.totalorder (!%p342_p9), %s1063_s29, 31  ;;  %1164 = vmatprep.mubr.f32.mxu0 (!%p342_p9), %v387_v0  ;;  %v483_v4 = vld [vmem:[%s1728_s2 + $0x18] sm:$0xff] (!%p342_p9)  ;;  %v388_v31 = vld [vmem:[%s1726_s0 + $0x8] sm:$0xff] (!%p342_p9)  ;;  %vm1424_vm1 = vmmov (!%p342_p9), 0  }
  0x10   : > { %v1273_v5 = vpack.c.bf16 (!%p342_p9), %v481_v2, %v480_v1  ;;  %v1277_v6 = vpack.c.bf16 (!%p342_p9), %v483_v4, %v482_v3  ;;  %v808_v33 = vld [vmem:[%s1733_s7] sm:$0xff] (!%p342_p9)  ;;  %v809_v34 = vld [vmem:[%s1733_s7 + $0x8] sm:$0xff] (!%p342_p9)  ;;  %v582_v41 = vld [vmem:[%s1731_s5 + $0x10] sm:$0xff] (!%p342_p9)  ;;  %v1425_v46 = vmov (!%p342_p9), 0.0   ;;  %vm910_vm2 = vcmask (!%p342_p9), 523264   ;;  %s1076_s16 = sshll.u32 (!%p342_p9), %s1508_s21, 7 }
  0x11   : > { %v1300_v35 = vpack.c.bf16 (!%p342_p9), %v809_v34, %v808_v33  ;;  %v580_v36 = vld [vmem:[%s1731_s5] sm:$0xff] (!%p342_p9)  ;;  %v581_v37 = vld [vmem:[%s1731_s5 + $0x8] sm:$0xff] (!%p342_p9)  ;;  %v583_v42 = vld [vmem:[%s1731_s5 + $0x18] sm:$0xff] (!%p342_p9)  ;;  %s1684_s12 = scalar_lea.hbm (!%p342_p9), %s1737_s11, %s1076_s16  ;;  %s1426_s21 = smov (!%p342_p9), [#allocation2]  }
  0x12   : > { %1274 = vmatprep.subr.bf16.mxu1 (!%p342_p9), %v1273_v5  ;;  %v1282_v39 = vpack.c.bf16 (!%p342_p9), %v581_v37, %v580_v36  ;;  %v1285_v43 = vpack.c.bf16 (!%p342_p9), %v583_v42, %v582_v41  ;;  %v810_v44 = vld [vmem:[%s1733_s7 + $0x10] sm:$0xff] (!%p342_p9)  ;;  %v811_v45 = vld [vmem:[%s1733_s7 + $0x18] sm:$0xff] (!%p342_p9)  ;;  %v576_v48 = vld [vmem:[%s1730_s4] sm:$0xff] (!%p342_p9) }
  0x13   : > { %1276 = vmatpush3.bf16.msra.mxu1 (!%p342_p9), %v1273_v5  ;;  %v1303_v47 = vpack.c.bf16 (!%p342_p9), %v811_v45, %v810_v44  ;;  %v577_v49 = vld [vmem:[%s1730_s4 + $0x8] sm:$0xff] (!%p342_p9)  ;;  %v1065_v50 = vld [vmem:[%s1729_s3] ss:$0 sm:$0xff] (!%p342_p9)  ;;  %v578_v55 = vld [vmem:[%s1730_s4 + $0x10] sm:$0xff] (!%p342_p9) }
  0x14   : > { %1278 = vmatprep.subr.bf16.mxu1 (!%p342_p9), %v1277_v6  ;;  %v1288_v52 = vpack.c.bf16 (!%p342_p9), %v577_v49, %v576_v48  ;;  %v579_v56 = vld [vmem:[%s1730_s4 + $0x18] sm:$0xff] (!%p342_p9)  ;;  %v730_v61 = vld [vmem:[%s1732_s6] sm:$0xff] (!%p342_p9)  ;;  %v731_v62 = vld [vmem:[%s1732_s6 + $0x8] sm:$0xff] (!%p342_p9) }
  0x15   : > { %v1291_v60 = vpack.c.bf16 (!%p342_p9), %v579_v56, %v578_v55  ;;  %v1294_v63 = vpack.c.bf16 (!%p342_p9), %v731_v62, %v730_v61  ;;  %v732_v0 = vld [vmem:[%s1732_s6 + $0x10] sm:$0xff] (!%p342_p9)  ;;  %v733_v1 = vld [vmem:[%s1732_s6 + $0x18] sm:$0xff] (!%p342_p9)  ;;  %v895_v4 = vld [vmem:[%s1735_s9] sm:$0xff] (!%p342_p9) }
  0x16   : > { %s1747_s29 = smov (!%p382_p10, %s1063_s29), 31  ;;  %v1297_v2 = vpack.c.bf16 %v733_v1, %v732_v0  ;;  %v896_v5 = vld [vmem:[%s1735_s9 + $0x8] sm:$0xff] }
  0x17   : > { %s1064_s30 = sshll.u32 %s1747_s29, 3  ;;  %1280 = vmatpush3.bf16.msra.mxu1 %v1277_v6  ;;  %v1306_v6 = vpack.c.bf16 %v896_v5, %v895_v4 }
  0x18   : > { %s1554_s14 = scalar_lea.vmem %s1727_s1, %s1064_s30  ;;  %1281 = vmatprep.subr.bf16.mxu1 %v1423_v32 }
  0x19   : > { %v389_v7 = vld [vmem:[%s1554_s14] sm:$0xff]  ;;  %v390_v8 = vld [vmem:[%s1554_s14 + $0x8] sm:$0xff]  ;;  %v391_v9 = vld [vmem:[%s1554_s14 + $0x10] sm:$0xff] }
  0x1a   : > { %v1241_v10 = vpack.c.bf16 %v390_v8, %v389_v7  ;;  %v392_v11 = vld [vmem:[%s1554_s14 + $0x18] sm:$0xff]  ;;  %v393_v13 = vld [vmem:[%s1554_s14 + $0x20] sm:$0xff]  ;;  %v394_v14 = vld [vmem:[%s1554_s14 + $0x28] sm:$0xff] }
  0x1b   : > { %v1245_v12 = vpack.c.bf16 %v392_v11, %v391_v9  ;;  %v1249_v15 = vpack.c.bf16 %v394_v14, %v393_v13  ;;  %v395_v16 = vld [vmem:[%s1554_s14 + $0x30] sm:$0xff]  ;;  %v396_v17 = vld [vmem:[%s1554_s14 + $0x38] sm:$0xff]  ;;  %v397_v19 = vld [vmem:[%s1554_s14 + $0x40] sm:$0xff] }
  0x1c   : > { %1242 = vmatprep.subr.bf16.mxu0 %v1241_v10  ;;  %v1253_v18 = vpack.c.bf16 %v396_v17, %v395_v16  ;;  %v398_v20 = vld [vmem:[%s1554_s14 + $0x48] sm:$0xff]  ;;  %v399_v22 = vld [vmem:[%s1554_s14 + $0x50] sm:$0xff]  ;;  %v400_v23 = vld [vmem:[%s1554_s14 + $0x58] sm:$0xff] }
  0x1d   : > { %1244 = vmatpush3.bf16.msra.mxu0 %v1241_v10  ;;  %v1257_v21 = vpack.c.bf16 %v398_v20, %v397_v19  ;;  %v1261_v24 = vpack.c.bf16 %v400_v23, %v399_v22  ;;  %v401_v25 = vld [vmem:[%s1554_s14 + $0x60] sm:$0xff]  ;;  %v402_v26 = vld [vmem:[%s1554_s14 + $0x68] sm:$0xff]  ;;  %v403_v28 = vld [vmem:[%s1554_s14 + $0x70] sm:$0xff] }
  0x1e   : > { %1246 = vmatprep.subr.bf16.mxu0 %v1245_v12  ;;  %v1265_v27 = vpack.c.bf16 %v402_v26, %v401_v25  ;;  %v404_v29 = vld [vmem:[%s1554_s14 + $0x78] sm:$0xff]  ;;  %v897_v7 = vld [vmem:[%s1735_s9 + $0x10] sm:$0xff]  ;;  %v899_v10 = vld [vmem:[%s1735_s9 + $0x20] sm:$0xff]  ;;  %s378_s14 = sand.u32 1, %s1413_s18  }
  0x1f   : > { %v1269_v30 = vpack.c.bf16 %v404_v29, %v403_v28  ;;  %v898_v8 = vld [vmem:[%s1735_s9 + $0x18] sm:$0xff]  ;;  %v900_v11 = vld [vmem:[%s1735_s9 + $0x28] sm:$0xff]  ;;  %v901_v13 = vld [vmem:[%s1735_s9 + $0x30] sm:$0xff]  ;;  %s1062_s26 = sshll.u32 %s378_s14, 3  ;;  %s986_s13 = scalar_lea.sflag [#allocation3], %s378_s14 }
  0x20   : > { %v1309_v9 = vpack.c.bf16 %v898_v8, %v897_v7  ;;  %v902_v14 = vld [vmem:[%s1735_s9 + $0x38] sm:$0xff]  ;;  %v1072_v26 = vld [vmem:[%s1734_s8] ss:$0 sm:$0xff]  ;;  %s380_s22 = scalar_lea.vmem [#allocation2], %s1062_s26  ;;  %s1363_s26 = sshll.u32 %s1426_s21, 4  ;;  %s1364_s26 = int_to_ptr.vmem [resolvable:$false] %s1363_s26 }
  0x21   : > { %1248 = vmatpush3.bf16.msra.mxu0 %v1245_v12  ;;  %v1312_v12 = vpack.c.bf16 %v900_v11, %v899_v10  ;;  %s999_s24 = sshll.u32 %s380_s22, 4  ;;  %s1365_s15 = scalar_lea.vmem %s1364_s26, 256  ;;  %s1686_s24 = int_to_ptr.vmem [resolvable:$true] %s999_s24 }
  0x22   : > { %1250 = vmatprep.subr.bf16.mxu0 %v1249_v15  ;;  %s1359_s29 = scalar_lea.vmem %s1686_s24, 128  ;;  %p1366_p0 = scmp.lt.s32.totalorder %s1686_s24, %s1364_s26 }
  0x23   : > { %p1360_p11 = scmp.ne.s32.totalorder %s1686_s24, %s1359_s29  ;;  %p1367_p1 = scmp.lt.s32.totalorder %s1365_s15, %s1359_s29 }
  0x25   : > { %1252 = vmatpush3.bf16.msra.mxu0 %v1249_v15  ;;  %v1315_v15 = vpack.c.bf16 %v902_v14, %v901_v13  ;;  %p1361_p12 = pnand %p1360_p11, %p1525_p5  ;;  %p1368_p2 = por %p1367_p1, %p1366_p0 }
  0x26   : > { %1254 = vmatprep.subr.bf16.mxu0 %v1253_v18 }
  0x27   : > { %p1362_p13 = pneg %p1361_p12 }
  0x29   : > { %1256 = vmatpush3.bf16.msra.mxu0 %v1253_v18  ;;  %p1369_p3 = pnand %p1368_p2, %p1362_p13 }
  0x2a   : > { %1258 = vmatprep.subr.bf16.mxu0 %v1257_v21 }
  0x2d   : > { %1260 = vmatpush3.bf16.msra.mxu0 %v1257_v21 }
  0x2e   : > { %1262 = vmatprep.subr.bf16.mxu0 %v1261_v24 }
  0x31   : > { %1264 = vmatpush3.bf16.msra.mxu0 %v1261_v24 }
  0x32   : > { %1266 = vmatprep.subr.bf16.mxu0 %v1265_v27 }
  0x35   : > { %1268 = vmatpush3.bf16.msra.mxu0 %v1265_v27 }
  0x36   : > { %1270 = vmatprep.subr.bf16.mxu0 %v1269_v30 }
  0x39   : > { %1272 = vmatpush3.bf16.msra.mxu0 %v1269_v30  ;;  %v1073_v30 = vld [vmem:[%s1736_s10] ss:$0 sm:$0xff] }
  0x3a   : > { %1299 = vmatprep.subr.bf16.mxu0 %v1423_v32 }
  0x3c   : > { %1165 = vmatmul.mubr.f32.vlgmr.msra.gmra.mrb[0].mxu0 %v388_v31 }
  0x3d   : > { %1301 = vmatpush3.bf16.msra.mxu0 %v1300_v35  ;;  %1219 = vmatprep.mubr.msk.f32.mxu0 %vm1424_vm1, %v1425_v46 }
  0x3e   : > { %1302 = vmatprep.subr.bf16.mxu0 %v1423_v32 }
  0x41   : > { %1304 = vmatpush3.bf16.msra.mxu0 %v1303_v47 }
 0x10f   : > { %v1166_v38 = vpop.f32.mrb[0].mxu0 }
 0x110   : > { %v471_v40 = vpop.f32.mrb[1].mxu0 }
 0x111   : > { %1175 = vmatprep.mubr.msk.f32.mxu1 %vm491_vm0, %v471_v40 }
 0x112   : > { %1176 = vmatmul.mubr.msk.f32.vlgmr.msra.gmra.mrb[0].mxu1 %vm491_vm0, %v1166_v38 }
 0x113   : > { %1283 = vmatpush3.bf16.msra.mxu1 %v1282_v39  ;;  %1186 = vmatprep.mubr.msk.f32.mxu1 %vm1424_vm1, %v1425_v46 }
 0x114   : > { %1284 = vmatprep.subr.bf16.mxu1 %v1423_v32 }
 0x117   : > { %1286 = vmatpush3.bf16.msra.mxu1 %v1285_v43 }
 0x118   : > { %1287 = vmatprep.subr.bf16.mxu1 %v1423_v32 }
 0x1e5   : > { %v1177_v51 = vpop.f32.mrb[0].mxu1 }
 0x1e6   : > { %v570_v53 = vadd.f32 %v1177_v51, %v1065_v50  ;;  %v564_v54 = vpop.f32.mrb[1].mxu1 }
 0x1e7   : > { %v565_v57 = vadd.f32 %v1065_v50, %v564_v54 }
 0x1e8   : > { %1187 = vmatmul.mubr.msk.f32.vlgmr.msra.gmra.mrb[2].mxu1 %vm491_vm0, %v570_v53 }
 0x1e9   : > { %v573_v58 = vsub.f32 %v565_v57, %v570_v53  ;;  %v575_v59 = vmul.f32 %v570_v53, %v565_v57  ;;  %1289 = vmatpush3.bf16.msra.mxu1 %v1288_v52  ;;  %1197 = vmatprep.mubr.msk.f32.mxu1 %vm1424_vm1, %v1425_v46 }
 0x1ea   : > { %1290 = vmatprep.subr.bf16.mxu1 %v1423_v32 }
 0x1eb   : > { %1220 = vmatmul.mubr.msk.f32.vlgmr.msra.gmra.mrb[2].mxu0 %vm491_vm0, %v575_v59  ;;  %v574_v3 = vand.u32 2147483647, %v573_v58 }
 0x1ed   : > { %1292 = vmatpush3.bf16.msra.mxu1 %v1291_v60 }
 0x1ee   : > { %1293 = vmatprep.subr.bf16.mxu1 %v1423_v32 }
 0x1f0   : > { %1198 = vmatmul.mubr.msk.f32.vlgmr.msra.gmra.mrb[4].mxu1 %vm491_vm0, %v565_v57 }
 0x1f1   : > { %1295 = vmatpush3.bf16.msra.mxu1 %v1294_v63  ;;  %1208 = vmatprep.mubr.msk.f32.mxu1 %vm1424_vm1, %v1425_v46 }
 0x1f2   : > { %1296 = vmatprep.subr.bf16.mxu1 %v1423_v32 }
 0x1f5   : > { %1298 = vmatpush3.bf16.msra.mxu1 %v1297_v2 }
 0x1f6   : > { %1305 = vmatprep.subr.bf16.mxu1 %v1423_v32 }
 0x1f8   : > { %1209 = vmatmul.mubr.msk.f32.vlgmr.msra.gmra.mrb[6].mxu1 %vm491_vm0, %v574_v3 }
 0x1f9   : > { %1238 = vmatprep.mubr.msk.f32.mxu1 %vm1424_vm1, %v1425_v46  ;;  %1307 = vmatpush3.bf16.msra.mxu1 %v1306_v6 }
 0x1fa   : > { %1308 = vmatprep.subr.bf16.mxu1 %v1423_v32 }
 0x1fd   : > { %1310 = vmatpush3.bf16.msra.mxu1 %v1309_v9 }
 0x1fe   : > { %1311 = vmatprep.subr.bf16.mxu1 %v1423_v32 }
 0x201   : > { %1313 = vmatpush3.bf16.msra.mxu1 %v1312_v12 }
 0x202   : > { %1314 = vmatprep.subr.bf16.mxu1 %v1423_v32 }
 0x205   : > { %1316 = vmatpush3.bf16.msra.mxu1 %v1315_v15 }
 0x2bb   : > { %v653_v16 = vpop.f32.mrb[2].mxu1 }
 0x2bc   : > { %v1188_v17 = vpop.f32.mrb[3].mxu1 }
 0x2be   : > { %v881_v18 = vpop.f32.mrb[2].mxu0 }
 0x2bf   : > { %v1221_v19 = vpop.f32.mrb[3].mxu0 }
 0x2c3   : > { %v726_v20 = vpop.f32.mrb[4].mxu1 }
 0x2c4   : > { %v727_v21 = vadd.f32 %v726_v20, %v653_v16  ;;  %v1199_v22 = vpop.f32.mrb[5].mxu1 }
 0x2cb   : > { %v803_v23 = vpop.f32.mrb[6].mxu1 }
 0x2cc   : > { %v807_v24 = vadd.f32 %v803_v23, %v727_v21  ;;  %v1210_v25 = vpop.f32.mrb[7].mxu1 }
 0x2ce   : > { %v885_v27 = vadd.f32 %v881_v18, %v807_v24 }
 0x2d0   : > { %v893_v28 = vadd.f32 %v1072_v26, %v885_v27 }
 0x2d2   : > { %v894_v29 = vmax.f32 %v893_v28, 0.0 }
 0x2d4   : > { %1239 = vmatmul.mubr.msk.f32.vlgmr.msra.gmra.mrb[8].mxu1 %vm910_vm2, %v894_v29 }
 0x3a7   : > { %v980_v31 = vpop.f32.mrb[8].mxu1 }
 0x3a8   : > { %v981_v32 = vadd.f32 %v1073_v30, %v980_v31  ;;  %v1240_v33 = vpop.f32.mrb[9].mxu1 }
 0x3aa   : > { %984 = vst [vmem:[%s380_s22] sm:$0xff] %v981_v32 }
 0x3ab   : > { %1372 = shalt.err (!%p1369_p3)
}
 0x3ac   : > { %s1373_s14 = scalar_lea.hbm %s1684_s12, 128  ;;  %s1377_s25 = scalar_lea.hbm %s1737_s11, 256 }
 0x3ad   : > { %p1374_p4 = scmp.ne.s32.totalorder %s1684_s12, %s1373_s14  ;;  %p1378_p9 = scmp.lt.u32.totalorder %s1684_s12, %s1737_s11 }
 0x3ae   : > { %p1379_p10 = scmp.lt.u32.totalorder %s1377_s25, %s1373_s14  ;;  %p1381_p12 = scmp.lt.u32.totalorder %s1373_s14, %s1684_s12 }
 0x3af   : > { %p1375_p7 = pnand %p1374_p4, %p1525_p5 }
 0x3b0   : > { %p1380_p11 = por %p1379_p10, %p1378_p9 }
 0x3b1   : > { %p1376_p8 = pneg %p1375_p7 }
 0x3b2   : > { %p1382_p13 = por %p1381_p12, %p1380_p11 }
 0x3b4   : > { %p1383_p0 = pnand %p1382_p13, %p1376_p8 }
 0x3b6   : > { %1386 = shalt.err (!%p1383_p0)
}
 0x3b7   : > { %1317 = dma.vmem_to_hbm [thread:$0]  (%p1525_p5), %s1686_s24, 128, %s1684_s12, %s986_s13  }
 0x3b8 PF: > { %p1323_p1 = scmp.ge.s32.totalorder %s1421_s20, 2  ;;  %s1011_s29 = sand.u32 1, %s1409_s17  }
 0x3b9   : > { %s1012_s26 = scalar_lea.sflag [#allocation3], %s1011_s29 }
 0x3ba   : > { %p1320_p2 = pnand %p1323_p1, %p1529_p6 }
 0x3bc   : > { %1404 = dma.done.wait (!%p1320_p2), %s1012_s26, 128  }
 0x3bd   : > { %1406 = vsyncadd (!%p1320_p2), %s1012_s26, 4294967168  ;;  %s1741_s15 = sld [smem:[#allocation5_spill]]  ;;  %p21_p3 = scmp.ge.s32.totalorder %s1512_s23, 4  }
 0x3be   : > { %s1742_s17 = smov %s1413_s18  ;;  %s1743_s18 = smov %s1417_s19 }
 0x3bf   : > { %s1745_s20 = smov %s1512_s23  ;;  %23 = sbr.rel (!%p21_p3) target bundleno = 3 (0x3), region = 99 }
 0x3c3   : > { %s1744_s19 = smov %s1741_s15 }
 0x3c6   :  { %1017 = vsyncpa [#allocation3], 1 }
 0x3c7   :  { %1019 = vsyncpa [#allocation3 + $0x1], 1 }

</bundles_post_ra>
